<compile_context>
chip_gen: v5e
topology: v5e:2x2
jax: 0.10.0
libtpu: 0.0.40
codegen_flags: <defaults>
</compile_context>

<pallas_src>
import functools

import jax
import jax.numpy as jnp
from jax.experimental import pallas as pl
from jax.experimental.pallas import tpu as pltpu


def _make_critic_kernel(use_bf16: bool):
    if use_bf16:
        cast = lambda a: a.astype(jnp.bfloat16)
    else:
        cast = lambda a: a

    def critic_kernel(x_ref,
                      w1_ref, b1_ref,
                      w2_ref, b2_ref,
                      w3_ref, b3_ref,
                      w4_ref, b4_ref,
                      o_ref):
        # Layer 1: (TB, F) @ (F, H) + (1, H) -> ReLU   (MXU, f32 accumulate)
        h = jnp.dot(cast(x_ref[...]), cast(w1_ref[...]),
                    preferred_element_type=jnp.float32)
        h = jnp.maximum(h + b1_ref[...], 0.0)
        # Layer 2: (TB, H) @ (H, H) + (1, H) -> ReLU
        h = jnp.dot(cast(h), cast(w2_ref[...]),
                    preferred_element_type=jnp.float32)
        h = jnp.maximum(h + b2_ref[...], 0.0)
        # Layer 3: (TB, H) @ (H, H) + (1, H) -> ReLU
        h = jnp.dot(cast(h), cast(w3_ref[...]),
                    preferred_element_type=jnp.float32)
        h = jnp.maximum(h + b3_ref[...], 0.0)
        # Layer 4 (value head, H -> 1): VPU multiply + XLU lane reduction.
        # w4_ref is a (1, H) row; this avoids pushing a 1-useful-column matmul
        # through the MXU.
        v = jnp.sum(h * w4_ref[...], axis=-1, keepdims=True) + b4_ref[...]
        o_ref[...] = v.astype(o_ref.dtype)

    return critic_kernel


@functools.partial(jax.jit, static_argnames=("tile_b", "use_bf16"))
def critic_forward(x, params, *, tile_b: int = 256, use_bf16: bool = False):
    """x: (B, in_features) float32. params: dict (w1,b1,...,w4,b4).

    Returns (B,) float32, matching PyTorch Critic.forward (x.view(-1)).
    """
    B, F_in = x.shape
    H = params["w1"].shape[1]

    # Pick the batch tile: full (8-aligned) batch for small B, else tile_b.
    if B >= tile_b:
        tb = tile_b
    else:
        tb = max(8, ((B + 7) // 8) * 8)
    b_pad = ((B + tb - 1) // tb) * tb
    if b_pad != B:
        x = jnp.pad(x, ((0, b_pad - B), (0, 0)))
    num_tiles = b_pad // tb

    # Value-head weight as a lane-aligned (1, H) row.
    w4_row = params["w4"].reshape(1, H)

    # Resident-in-VMEM specs for weights/biases (constant block index).
    def resident(shape):
        return pl.BlockSpec(shape, lambda i: (0, 0))

    flops = 2 * b_pad * (F_in * H + 2 * H * H + H)
    bytes_accessed = 4 * (b_pad * (F_in + 1)          # x in + v out
                          + F_in * H + 2 * H * H + H  # weights
                          + 3 * H + 1)                # biases

    out = pl.pallas_call(
        _make_critic_kernel(use_bf16),
        out_shape=jax.ShapeDtypeStruct((b_pad, 1), jnp.float32),
        grid=(num_tiles,),
        in_specs=[
            pl.BlockSpec((tb, F_in), lambda i: (i, 0)),   # x tile
            resident((F_in, H)), resident((1, H)),        # w1, b1
            resident((H, H)),    resident((1, H)),        # w2, b2
            resident((H, H)),    resident((1, H)),        # w3, b3
            resident((1, H)),    resident((1, 1)),        # w4 (row), b4
        ],
        out_specs=pl.BlockSpec((tb, 1), lambda i: (i, 0)),
        compiler_params=pltpu.CompilerParams(
            dimension_semantics=("parallel",)),
        cost_estimate=pl.CostEstimate(
            flops=flops, transcendentals=0, bytes_accessed=bytes_accessed),
    )(x,
      params["w1"], params["b1"],
      params["w2"], params["b2"],
      params["w3"], params["b3"],
      w4_row, params["b4"])

    # PyTorch: x.view(-1); drop padded rows.
    return out[:B, 0]


def init_critic_params(key, in_features, hid_dim=128):
    """Deterministic init mimicking PyTorch nn.Linear default
    (U[-1/sqrt(fan_in), 1/sqrt(fan_in)])."""
    keys = jax.random.split(key, 8)
    dims = [(in_features, hid_dim), (hid_dim, hid_dim),
            (hid_dim, hid_dim), (hid_dim, 1)]
    params = {}
    for i, (fan_in, fan_out) in enumerate(dims, start=1):
        bound = 1.0 / jnp.sqrt(jnp.float32(fan_in))
        w = jax.random.uniform(keys[2 * (i - 1)], (fan_in, fan_out),
                               minval=-bound, maxval=bound, dtype=jnp.float32)
        b = jax.random.uniform(keys[2 * (i - 1) + 1], (1, fan_out),
                               minval=-bound, maxval=bound, dtype=jnp.float32)
        params[f"w{i}"] = w
        params[f"b{i}"] = b
    return params


def critic_reference(x, params):
    """Pure-JAX reference of the same forward pass."""
    h = jnp.maximum(x @ params["w1"] + params["b1"], 0.0)
    h = jnp.maximum(h @ params["w2"] + params["b2"], 0.0)
    h = jnp.maximum(h @ params["w3"] + params["b3"], 0.0)
    v = h @ params["w4"] + params["b4"]
    return v.reshape(-1)


if __name__ == "__main__":
    key = jax.random.PRNGKey(0)
    k_param, k_x1, k_x2 = jax.random.split(key, 3)

    in_features = 8    # LunarLander observation dim
    hid_dim = 128
    params = init_critic_params(k_param, in_features, hid_dim)

    # Small per-step batch (single tile path).
    B = 8
    x = jax.random.normal(k_x1, (B, in_features), dtype=jnp.float32)
    out = jax.block_until_ready(critic_forward(x, params))
    ref = critic_reference(x, params)
    assert out.shape == (B,), f"expected shape ({B},), got {out.shape}"
    assert jnp.allclose(out, ref, atol=1e-5, rtol=1e-5), "mismatch (B=8)"

    # Rollout-sized batch with a non-divisible B (exercises grid + padding).
    B2 = 300
    x2 = jax.random.normal(k_x2, (B2, in_features), dtype=jnp.float32)
    out2 = jax.block_until_ready(critic_forward(x2, params, tile_b=128))
    ref2 = critic_reference(x2, params)
    assert out2.shape == (B2,), f"expected shape ({B2},), got {out2.shape}"
    assert jnp.allclose(out2, ref2, atol=1e-5, rtol=1e-5), "mismatch (B=300)"

    print("KERNEL_OK")
</pallas_src>

<mosaic_0001>
module attributes {stable_mosaic.version = 11 : i64} {
  func.func @critic_kernel(%arg0: i32, %arg1: memref<8x8xf32, #tpu.memory_space<vmem>>, %arg2: memref<8x128xf32, #tpu.memory_space<vmem>>, %arg3: memref<1x128xf32, #tpu.memory_space<vmem>>, %arg4: memref<128x128xf32, #tpu.memory_space<vmem>>, %arg5: memref<1x128xf32, #tpu.memory_space<vmem>>, %arg6: memref<128x128xf32, #tpu.memory_space<vmem>>, %arg7: memref<1x128xf32, #tpu.memory_space<vmem>>, %arg8: memref<1x128xf32, #tpu.memory_space<vmem>>, %arg9: memref<1x1xf32, #tpu.memory_space<vmem>>, %arg10: memref<8x1xf32, #tpu.memory_space<vmem>>) attributes {dimension_semantics = [#tpu.dimension_semantics<parallel>], iteration_bounds = array<i64: 1>, scalar_prefetch = 0 : i64, scratch_operands = 0 : i64, tpu.core_type = #tpu.core_type<tc>, window_params = [{transform_indices = @transform_0, window_bounds = array<i64: 8, 8>}, {pipeline_mode = #tpu.pipeline_mode<synchronous>, transform_indices = @transform_1, window_bounds = array<i64: 8, 128>}, {pipeline_mode = #tpu.pipeline_mode<synchronous>, transform_indices = @transform_2, window_bounds = array<i64: 1, 128>}, {pipeline_mode = #tpu.pipeline_mode<synchronous>, transform_indices = @transform_3, window_bounds = array<i64: 128, 128>}, {pipeline_mode = #tpu.pipeline_mode<synchronous>, transform_indices = @transform_4, window_bounds = array<i64: 1, 128>}, {pipeline_mode = #tpu.pipeline_mode<synchronous>, transform_indices = @transform_5, window_bounds = array<i64: 128, 128>}, {pipeline_mode = #tpu.pipeline_mode<synchronous>, transform_indices = @transform_6, window_bounds = array<i64: 1, 128>}, {pipeline_mode = #tpu.pipeline_mode<synchronous>, transform_indices = @transform_7, window_bounds = array<i64: 1, 128>}, {pipeline_mode = #tpu.pipeline_mode<synchronous>, transform_indices = @transform_8, window_bounds = array<i64: 1, 1>}, {transform_indices = @transform_9, window_bounds = array<i64: 8, 1>}]} {
    %c0 = arith.constant 0 : index
    %c0_0 = arith.constant 0 : index
    %0 = vector.load %arg1[%c0, %c0_0] : memref<8x8xf32, #tpu.memory_space<vmem>>, vector<8x8xf32>
    %c0_1 = arith.constant 0 : index
    %c0_2 = arith.constant 0 : index
    %1 = vector.load %arg2[%c0_1, %c0_2] : memref<8x128xf32, #tpu.memory_space<vmem>>, vector<8x128xf32>
    %cst = arith.constant dense<0.000000e+00> : vector<8x128xf32>
    %2 = tpu.matmul %0, %1, %cst {dimension_numbers = #tpu.dot_dimension_numbers<[1], [0], [0], [1], [0, 0, 1, 1], [], []>} : vector<8x8xf32>, vector<8x128xf32>, vector<8x128xf32> -> vector<8x128xf32>
    %c0_3 = arith.constant 0 : index
    %c0_4 = arith.constant 0 : index
    %3 = vector.load %arg3[%c0_3, %c0_4] : memref<1x128xf32, #tpu.memory_space<vmem>>, vector<1x128xf32>
    %4 = vector.broadcast %3 : vector<1x128xf32> to vector<8x128xf32>
    %5 = arith.addf %2, %4 : vector<8x128xf32>
    %cst_5 = arith.constant 0.000000e+00 : f32
    %6 = vector.broadcast %cst_5 : f32 to vector<8x128xf32>
    %7 = arith.maximumf %5, %6 : vector<8x128xf32>
    %c0_6 = arith.constant 0 : index
    %c0_7 = arith.constant 0 : index
    %8 = vector.load %arg4[%c0_6, %c0_7] : memref<128x128xf32, #tpu.memory_space<vmem>>, vector<128x128xf32>
    %cst_8 = arith.constant dense<0.000000e+00> : vector<8x128xf32>
    %9 = tpu.matmul %7, %8, %cst_8 {dimension_numbers = #tpu.dot_dimension_numbers<[1], [0], [0], [1], [0, 0, 1, 1], [], []>} : vector<8x128xf32>, vector<128x128xf32>, vector<8x128xf32> -> vector<8x128xf32>
    %c0_9 = arith.constant 0 : index
    %c0_10 = arith.constant 0 : index
    %10 = vector.load %arg5[%c0_9, %c0_10] : memref<1x128xf32, #tpu.memory_space<vmem>>, vector<1x128xf32>
    %11 = vector.broadcast %10 : vector<1x128xf32> to vector<8x128xf32>
    %12 = arith.addf %9, %11 : vector<8x128xf32>
    %cst_11 = arith.constant 0.000000e+00 : f32
    %13 = vector.broadcast %cst_11 : f32 to vector<8x128xf32>
    %14 = arith.maximumf %12, %13 : vector<8x128xf32>
    %c0_12 = arith.constant 0 : index
    %c0_13 = arith.constant 0 : index
    %15 = vector.load %arg6[%c0_12, %c0_13] : memref<128x128xf32, #tpu.memory_space<vmem>>, vector<128x128xf32>
    %cst_14 = arith.constant dense<0.000000e+00> : vector<8x128xf32>
    %16 = tpu.matmul %14, %15, %cst_14 {dimension_numbers = #tpu.dot_dimension_numbers<[1], [0], [0], [1], [0, 0, 1, 1], [], []>} : vector<8x128xf32>, vector<128x128xf32>, vector<8x128xf32> -> vector<8x128xf32>
    %c0_15 = arith.constant 0 : index
    %c0_16 = arith.constant 0 : index
    %17 = vector.load %arg7[%c0_15, %c0_16] : memref<1x128xf32, #tpu.memory_space<vmem>>, vector<1x128xf32>
    %18 = vector.broadcast %17 : vector<1x128xf32> to vector<8x128xf32>
    %19 = arith.addf %16, %18 : vector<8x128xf32>
    %cst_17 = arith.constant 0.000000e+00 : f32
    %20 = vector.broadcast %cst_17 : f32 to vector<8x128xf32>
    %21 = arith.maximumf %19, %20 : vector<8x128xf32>
    %c0_18 = arith.constant 0 : index
    %c0_19 = arith.constant 0 : index
    %22 = vector.load %arg8[%c0_18, %c0_19] : memref<1x128xf32, #tpu.memory_space<vmem>>, vector<1x128xf32>
    %23 = vector.broadcast %22 : vector<1x128xf32> to vector<8x128xf32>
    %24 = arith.mulf %21, %23 : vector<8x128xf32>
    %cst_20 = arith.constant dense<0.000000e+00> : vector<8xf32>
    %25 = vector.multi_reduction <add>, %24, %cst_20 [1] : vector<8x128xf32> to vector<8xf32>
    %26 = vector.shape_cast %25 : vector<8xf32> to vector<8x1xf32>
    %c0_21 = arith.constant 0 : index
    %c0_22 = arith.constant 0 : index
    %27 = vector.load %arg9[%c0_21, %c0_22] : memref<1x1xf32, #tpu.memory_space<vmem>>, vector<1x1xf32>
    %28 = vector.broadcast %27 : vector<1x1xf32> to vector<8x1xf32>
    %29 = arith.addf %26, %28 : vector<8x1xf32>
    %c0_23 = arith.constant 0 : index
    %c0_24 = arith.constant 0 : index
    %30 = vector.load %arg10[%c0_23, %c0_24] : memref<8x1xf32, #tpu.memory_space<vmem>>, vector<8x1xf32>
    tpu.vector_store %arg10[%c0_23, %c0_24], %29 {strides = array<i32>} : memref<8x1xf32, #tpu.memory_space<vmem>>, vector<8x1xf32>,
    return
  }
  func.func @transform_0(%arg0: i32) -> (i32, i32) {
    %c0_i32 = arith.constant 0 : i32
    %c0_i32_0 = arith.constant 0 : i32
    return %arg0, %c0_i32 : i32, i32
  }
  func.func @transform_1(%arg0: i32) -> (i32, i32) {
    %c0_i32 = arith.constant 0 : i32
    %c0_i32_0 = arith.constant 0 : i32
    %c0_i32_1 = arith.constant 0 : i32
    return %c0_i32, %c0_i32_0 : i32, i32
  }
  func.func @transform_2(%arg0: i32) -> (i32, i32) {
    %c0_i32 = arith.constant 0 : i32
    %c0_i32_0 = arith.constant 0 : i32
    %c0_i32_1 = arith.constant 0 : i32
    return %c0_i32, %c0_i32_0 : i32, i32
  }
  func.func @transform_3(%arg0: i32) -> (i32, i32) {
    %c0_i32 = arith.constant 0 : i32
    %c0_i32_0 = arith.constant 0 : i32
    %c0_i32_1 = arith.constant 0 : i32
    return %c0_i32, %c0_i32_0 : i32, i32
  }
  func.func @transform_4(%arg0: i32) -> (i32, i32) {
    %c0_i32 = arith.constant 0 : i32
    %c0_i32_0 = arith.constant 0 : i32
    %c0_i32_1 = arith.constant 0 : i32
    return %c0_i32, %c0_i32_0 : i32, i32
  }
  func.func @transform_5(%arg0: i32) -> (i32, i32) {
    %c0_i32 = arith.constant 0 : i32
    %c0_i32_0 = arith.constant 0 : i32
    %c0_i32_1 = arith.constant 0 : i32
    return %c0_i32, %c0_i32_0 : i32, i32
  }
  func.func @transform_6(%arg0: i32) -> (i32, i32) {
    %c0_i32 = arith.constant 0 : i32
    %c0_i32_0 = arith.constant 0 : i32
    %c0_i32_1 = arith.constant 0 : i32
    return %c0_i32, %c0_i32_0 : i32, i32
  }
  func.func @transform_7(%arg0: i32) -> (i32, i32) {
    %c0_i32 = arith.constant 0 : i32
    %c0_i32_0 = arith.constant 0 : i32
    %c0_i32_1 = arith.constant 0 : i32
    return %c0_i32, %c0_i32_0 : i32, i32
  }
  func.func @transform_8(%arg0: i32) -> (i32, i32) {
    %c0_i32 = arith.constant 0 : i32
    %c0_i32_0 = arith.constant 0 : i32
    %c0_i32_1 = arith.constant 0 : i32
    return %c0_i32, %c0_i32_0 : i32, i32
  }
  func.func @transform_9(%arg0: i32) -> (i32, i32) {
    %c0_i32 = arith.constant 0 : i32
    %c0_i32_0 = arith.constant 0 : i32
    return %arg0, %c0_i32 : i32, i32
  }
}

</mosaic_0001>

<bundles_post_ra>
// kernel: critic_forward.1
= control target key start
LH: loop header
LB: loop body
LE: loop exit
PB: predicated region body
PF: predicated region fallthrough
CT: control target
= control target key end

     0   :  { %s427_s0 = inlined_call_operand.hbm [shape: f32[8,8], index: 0, kind: input, shape index: {}]   ;;  %s428_s1 = inlined_call_operand.hbm [shape: f32[8,128], index: 1, kind: input, shape index: {}]   ;;  %s429_s2 = inlined_call_operand.vmem [shape: f32[1,128], index: 2, kind: input, shape index: {}]   ;;  %s430_s3 = inlined_call_operand.hbm [shape: f32[128,128], index: 3, kind: input, shape index: {}]   ;;  %s431_s4 = inlined_call_operand.vmem [shape: f32[1,128], index: 4, kind: input, shape index: {}]   ;;  %s432_s5 = inlined_call_operand.hbm [shape: f32[128,128], index: 5, kind: input, shape index: {}]   ;;  %s433_s6 = inlined_call_operand.vmem [shape: f32[1,128], index: 6, kind: input, shape index: {}]   ;;  %s434_s7 = inlined_call_operand.vmem [shape: f32[1,128], index: 7, kind: input, shape index: {}]   ;;  %s435_s8 = inlined_call_operand.<no memory space> [shape: f32[1,1], index: 8, kind: input, shape index: {}]   ;;  %s436_s9 = inlined_call_operand.vmem [shape: f32[8,1], index: 9, kind: output, shape index: {}]  }
   0x1   :  { %v14_v0 = vstv %s435_s8 }
   0x2   :  { %15 = vst [vmem:[#allocation2] sm:$0x1] %v14_v0 }
   0x3   :  { %16 = vsyncpa [#allocation4], 0 }
   0x4   :  { %17 = vsyncpa [#allocation6], 0  ;;  %s35_s13 = sshll.u32 %s428_s1, 4  ;;  %s36_s13 = int_to_ptr.hbm [resolvable:$true] %s35_s13 }
   0x5   :  { %18 = vsyncpa [#allocation9], 0  ;;  %s341_s14 = smov [#allocation5]   ;;  %s24_s18 = sshll.u32 %s427_s0, 4  ;;  %s25_s18 = int_to_ptr.hbm [resolvable:$true] %s24_s18 }
   0x6   :  { %s37_s15 = sshll.u32 %s341_s14, 4  ;;  %s342_s19 = smov [#allocation3]   ;;  %s38_s15 = int_to_ptr.vmem [resolvable:$true] %s37_s15 }
   0x7   :  { %40 = dma.hbm_to_vmem [thread:$0]  %s36_s13, 128, %s38_s15, [#allocation6]  }
   0x8   :  { %s26_s8 = sshll.u32 %s342_s19, 4  ;;  %s47_s22 = sshll.u32 %s430_s3, 4  ;;  %s27_s8 = int_to_ptr.vmem [resolvable:$true] %s26_s8  ;;  %s48_s22 = int_to_ptr.hbm [resolvable:$true] %s47_s22 }
   0x9   :  { %29 = dma.hbm_to_vmem [thread:$0]  %s25_s18, 128, %s27_s8, [#allocation4]  }
   0xa   :  { %s343_s1 = smov [#allocation7]   ;;  %s62_s26 = sshll.u32 %s432_s5, 4  ;;  %s63_s26 = int_to_ptr.hbm [resolvable:$true] %s62_s26 }
   0xb   :  { %s49_s23 = sshll.u32 %s343_s1, 4  ;;  %s344_s27 = smov 128   ;;  %s50_s23 = int_to_ptr.vmem [resolvable:$true] %s49_s23 }
   0xc   :  { %s345_s0 = smov 8   ;;  %s346_s28 = smov [#allocation8]  }
   0xd   :  { %55 = dma.hbm_to_vmem [thread:$0]  %s48_s22, 2048, %s50_s23, [#allocation6], %s344_s27, %s344_s27, %s345_s0  }
   0xe   :  { %s64_s29 = sshll.u32 %s346_s28, 4  ;;  %s65_s29 = int_to_ptr.vmem [resolvable:$true] %s64_s29 }
   0xf   :  { %70 = dma.hbm_to_vmem [thread:$0]  %s63_s26, 2048, %s65_s29, [#allocation9], %s344_s27, %s344_s27, %s345_s0  }
  0x10   :  { %335 = dma.done.wait [#allocation4], 128  }
  0x11   :  { %336 = vsyncadd [#allocation4], 4294967168 }
  0x12   :  { %337 = dma.done.wait [#allocation6], 2176  }
  0x13   :  { %338 = vsyncadd [#allocation6], 4294965120 }
  0x14   :  { %339 = dma.done.wait [#allocation9], 2048  }
  0x15   :  { %340 = vsyncadd [#allocation9], 4294965248  ;;  %vm99_vm0 = vcmask 64512   ;;  %v94_v1 = vld [vmem:[#allocation5] sm:$0xff]  ;;  %v93_v2 = vld [vmem:[#allocation3] sm:$0xff]  ;;  %vm218_vm1 = vcmask 7168  }
  0x16   :  { %v139_v3 = vld [vmem:[#allocation7 + $0x78] sm:$0xff]  ;;  %118 = vmatpush.msra.mxu0 %v94_v1  ;;  %v138_v4 = vld [vmem:[#allocation7 + $0x70] sm:$0xff]  ;;  %v137_v5 = vld [vmem:[#allocation7 + $0x68] sm:$0xff] }
  0x17   :  { %144 = vmatpush.msra.mxu1 %v139_v3  ;;  %227 = vmatmul.msk.f32.vlgmr.msra.gmra.mxu0 %vm99_vm0, %v93_v2  ;;  %v136_v6 = vld [vmem:[#allocation7 + $0x60] sm:$0xff]  ;;  %v135_v7 = vld [vmem:[#allocation7 + $0x58] sm:$0xff]  ;;  %v134_v8 = vld [vmem:[#allocation7 + $0x50] sm:$0xff] }
  0x18   :  { %v133_v9 = vld [vmem:[#allocation7 + $0x48] sm:$0xff]  ;;  %v132_v10 = vld [vmem:[#allocation7 + $0x40] sm:$0xff]  ;;  %v131_v11 = vld [vmem:[#allocation7 + $0x38] sm:$0xff] }
  0x19   :  { %145 = vmatpush.msra.mxu1 %v138_v4  ;;  %v130_v12 = vld [vmem:[#allocation7 + $0x30] sm:$0xff]  ;;  %v129_v13 = vld [vmem:[#allocation7 + $0x28] sm:$0xff]  ;;  %v128_v14 = vld [vmem:[#allocation7 + $0x20] sm:$0xff] }
  0x1a   :  { %v127_v15 = vld [vmem:[#allocation7 + $0x18] sm:$0xff]  ;;  %v126_v16 = vld [vmem:[#allocation7 + $0x10] sm:$0xff]  ;;  %v125_v17 = vld [vmem:[#allocation7 + $0x8] sm:$0xff] }
  0x1b   :  { %146 = vmatpush.msra.mxu1 %v137_v5  ;;  %v124_v18 = vld [vmem:[#allocation7] sm:$0xff]  ;;  %v180_v19 = vld [vmem:[#allocation8 + $0x78] sm:$0xff]  ;;  %v179_v20 = vld [vmem:[#allocation8 + $0x70] sm:$0xff] }
  0x1c   :  { %185 = vmatpush.msra.mxu2 %v180_v19  ;;  %v178_v21 = vld [vmem:[#allocation8 + $0x68] sm:$0xff]  ;;  %v177_v22 = vld [vmem:[#allocation8 + $0x60] sm:$0xff]  ;;  %v176_v23 = vld [vmem:[#allocation8 + $0x58] sm:$0xff] }
  0x1d   :  { %147 = vmatpush.msra.mxu1 %v136_v6  ;;  %v175_v24 = vld [vmem:[#allocation8 + $0x50] sm:$0xff]  ;;  %v174_v25 = vld [vmem:[#allocation8 + $0x48] sm:$0xff]  ;;  %v173_v26 = vld [vmem:[#allocation8 + $0x40] sm:$0xff] }
  0x1e   :  { %186 = vmatpush.msra.mxu2 %v179_v20  ;;  %v172_v27 = vld [vmem:[#allocation8 + $0x38] sm:$0xff]  ;;  %v171_v28 = vld [vmem:[#allocation8 + $0x30] sm:$0xff]  ;;  %v170_v29 = vld [vmem:[#allocation8 + $0x28] sm:$0xff] }
  0x1f   :  { %148 = vmatpush.msra.mxu1 %v135_v7  ;;  %v169_v30 = vld [vmem:[#allocation8 + $0x20] sm:$0xff]  ;;  %v168_v31 = vld [vmem:[#allocation8 + $0x18] sm:$0xff]  ;;  %v234_v32 = vld [vmem:[%s429_s2] ss:$0 sm:$0xff] }
  0x20   :  { %187 = vmatpush.msra.mxu2 %v178_v21  ;;  %v167_v36 = vld [vmem:[#allocation8 + $0x10] sm:$0xff]  ;;  %v166_v37 = vld [vmem:[#allocation8 + $0x8] sm:$0xff]  ;;  %v165_v38 = vld [vmem:[#allocation8] sm:$0xff] }
  0x21   :  { %149 = vmatpush.msra.mxu1 %v134_v8  ;;  %v235_v39 = vld [vmem:[%s431_s4] ss:$0 sm:$0xff] }
  0x22   :  { %188 = vmatpush.msra.mxu2 %v177_v22  ;;  %v236_v43 = vld [vmem:[%s433_s6] ss:$0 sm:$0xff] }
  0x23   :  { %150 = vmatpush.msra.mxu1 %v133_v9  ;;  %v237_v46 = vld [vmem:[%s434_s7] ss:$0 sm:$0xff] }
  0x24   :  { %189 = vmatpush.msra.mxu2 %v176_v23  ;;  %v238_v49 = vld [vmem:[#allocation2] ss:$0 sm:$0xff] }
  0x25   :  { %151 = vmatpush.msra.mxu1 %v132_v10 }
  0x26   :  { %190 = vmatpush.msra.mxu2 %v175_v24 }
  0x27   :  { %152 = vmatpush.msra.mxu1 %v131_v11 }
  0x28   :  { %191 = vmatpush.msra.mxu2 %v174_v25 }
  0x29   :  { %153 = vmatpush.msra.mxu1 %v130_v12 }
  0x2a   :  { %192 = vmatpush.msra.mxu2 %v173_v26 }
  0x2b   :  { %154 = vmatpush.msra.mxu1 %v129_v13 }
  0x2c   :  { %193 = vmatpush.msra.mxu2 %v172_v27 }
  0x2d   :  { %155 = vmatpush.msra.mxu1 %v128_v14 }
  0x2e   :  { %194 = vmatpush.msra.mxu2 %v171_v28 }
  0x2f   :  { %156 = vmatpush.msra.mxu1 %v127_v15 }
  0x30   :  { %195 = vmatpush.msra.mxu2 %v170_v29 }
  0x31   :  { %157 = vmatpush.msra.mxu1 %v126_v16 }
  0x32   :  { %196 = vmatpush.msra.mxu2 %v169_v30 }
  0x33   :  { %158 = vmatpush.msra.mxu1 %v125_v17 }
  0x34   :  { %197 = vmatpush.msra.mxu2 %v168_v31 }
  0x35   :  { %159 = vmatpush.msra.mxu1 %v124_v18 }
  0x36   :  { %198 = vmatpush.msra.mxu2 %v167_v36 }
  0x38   :  { %199 = vmatpush.msra.mxu2 %v166_v37 }
  0x3a   :  { %200 = vmatpush.msra.mxu2 %v165_v38 }
  0x94   :  { %v120_v33 = vpop.f32.mrf.mxu0 }
  0x95   :  { %v121_v34 = vadd.f32 %v234_v32, %v120_v33 }
  0x97   :  { %v123_v35 = vmax.f32 %v121_v34, 0.0 }
  0x99   :  { %160 = vmatmul.f32.vlgmr.msra.gmra.mxu1 %v123_v35 }
 0x116   :  { %v161_v40 = vpop.f32.mrf.mxu1 }
 0x117   :  { %v162_v41 = vadd.f32 %v235_v39, %v161_v40 }
 0x119   :  { %v164_v42 = vmax.f32 %v162_v41, 0.0 }
 0x11b   :  { %201 = vmatmul.f32.vlgmr.msra.gmra.mxu2 %v164_v42 }
 0x19e   :  { %v202_v44 = vpop.f32.mrf.mxu2 }
 0x19f   :  { %v203_v45 = vadd.f32 %v236_v43, %v202_v44 }
 0x1a1   :  { %v205_v47 = vmax.f32 %v203_v45, 0.0 }
 0x1a3   :  { %v210_v48 = vmul.f32 %v237_v46, %v205_v47 }
 0x1a5   :  { %211 = vadd.xlane.f32.xlu0 %v210_v48 }
 0x218   :  { %v212_v50 = vpop.xlane.xlu0 %211 }
 0x219   :  { %v217_v51 = vadd.f32 %v238_v49, %v212_v50 }
 0x21b   :  { %219 = vst.msk [vmem:[%s436_s9] sm:$0xff] %vm218_vm1, %v217_v51 }
 0x21c   :  { %224 = vsyncpa [#allocation4], 1 }
 0x21d   :  { %225 = vsyncpa [#allocation6], 1 }
 0x21e   :  { %226 = vsyncpa [#allocation9], 1 }

</bundles_post_ra>
